<compile_context>
chip_gen: v6e
topology: v6e:2x2x1
jax: 0.10.0
libtpu: 0.0.40
codegen_flags: <defaults>
</compile_context>

<pallas_src>
import functools

import jax
import jax.numpy as jnp
from jax import lax
from jax.experimental import pallas as pl
from jax.experimental.pallas import tpu as pltpu


def _round_up(x, m):
    return (x + m - 1) // m * m


def _cdiv(a, b):
    return (a + b - 1) // b


# ---------------------------------------------------------------------------
# Kernel
# ---------------------------------------------------------------------------
def _mlp_kernel(x_ref, w_in_ref, b_in_ref, w_hid_ref, b_hid_ref,
                w_out_ref, b_out_ref, o_ref, *, num_layers, compute_dtype):
    cd = compute_dtype

    # fc_in + ReLU.  K = s_dim (un-padded; Mosaic pads the MXU operand
    # internally).  Weights are already stored in compute_dtype, so only the
    # small activation tile is cast here; accumulation stays f32.
    h = jnp.dot(x_ref[...].astype(cd), w_in_ref[...],
                preferred_element_type=jnp.float32)
    h = jnp.maximum(h + b_in_ref[...], 0.0)

    def layer(i, h):
        hi = jnp.dot(h.astype(cd), w_hid_ref[i],
                     preferred_element_type=jnp.float32) + b_hid_ref[i]
        return jnp.maximum(hi, 0.0)

    if num_layers <= 8:
        # Small trip count: static unroll -> full LLO scheduler visibility.
        for i in range(num_layers):
            h = layer(i, h)
    else:
        # Large trip count: visible loop bounds the vreg live set; partial
        # unroll lets bias/ReLU (VPU) overlap the next layer's matmul (MXU).
        h = lax.fori_loop(0, num_layers, layer, h, unroll=2)

    # fc_out: contract the feature axis of the (1, h_pad) weight row against h,
    # producing a lane-dense (1, tb) packed output row (no (tb, 128) slab, no
    # dead MXU columns, 128x smaller writeback).
    out = lax.dot_general(w_out_ref[...], h.astype(cd),
                          dimension_numbers=(((1,), (1,)), ((), ())),
                          preferred_element_type=jnp.float32)
    o_ref[...] = (out + b_out_ref[...]).astype(o_ref.dtype)


# ---------------------------------------------------------------------------
# One-time parameter preparation (hoisted out of the per-call hot path)
# ---------------------------------------------------------------------------
def prepare_params(params, *, compute_dtype=jnp.float32):
    """Pad + pre-cast GlobalNet_v parameters once.

    Zero padding to lane multiples is exact (padded rows/cols contribute
    nothing).  Weights are stored pre-cast to `compute_dtype` (bf16 halves
    weight DMA/VMEM on all generations; v5e's MXU is bf16-native too).  Biases
    stay float32 since they are added after the f32 MXU accumulation.
    """
    s_dim, h_dim = params["w_in"].shape
    num_layers = int(params["w_hid"].shape[0])
    h_pad = _round_up(h_dim, 128)
    Lp = max(num_layers, 1)
    cd = compute_dtype

    w_in = jnp.zeros((s_dim, h_pad), cd).at[:, :h_dim].set(
        params["w_in"].astype(cd))
    b_in = jnp.zeros((1, h_pad), jnp.float32).at[:, :h_dim].set(params["b_in"])
    w_hid = jnp.zeros((Lp, h_pad, h_pad), cd)
    b_hid = jnp.zeros((Lp, 1, h_pad), jnp.float32)
    if num_layers > 0:
        w_hid = w_hid.at[:num_layers, :h_dim, :h_dim].set(
            params["w_hid"].astype(cd))
        b_hid = b_hid.at[:num_layers, :, :h_dim].set(params["b_hid"])
    # fc_out weight stored as a (1, h_pad) row (feature axis contracted in the
    # kernel), fc_out bias as a (1, 1) scalar block.
    w_out = jnp.zeros((1, h_pad), cd).at[:, :h_dim].set(
        params["w_out"].reshape(1, h_dim).astype(cd))
    b_out = params["b_out"].reshape(1, 1).astype(jnp.float32)

    return {
        "w_in": w_in, "b_in": b_in, "w_hid": w_hid, "b_hid": b_hid,
        "w_out": w_out, "b_out": b_out,
        "s_dim": int(s_dim), "h_dim": int(h_dim), "h_pad": int(h_pad),
        "num_layers": num_layers, "compute_dtype": cd,
    }


# ---------------------------------------------------------------------------
# Forward wrapper
# ---------------------------------------------------------------------------
def global_net_v_forward(state, prep, *, batch_tile=512):
    """state: (B, s_dim) float32.  prep: output of prepare_params()."""
    B, s_dim = state.shape
    assert s_dim == prep["s_dim"], (s_dim, prep["s_dim"])
    h_pad = prep["h_pad"]
    num_layers = prep["num_layers"]
    cd = prep["compute_dtype"]
    Lp = max(num_layers, 1)

    # Batch tiling: minimise padding and give v7x's two TensorCores work
    # (n_tiles >= 2 whenever B > 8); harmless on single-core v5e/v6e.
    n_tiles = _cdiv(B, batch_tile)
    if n_tiles == 1 and B > 8:
        n_tiles = 2
    tb = _round_up(_cdiv(B, n_tiles), 8)
    B_pad = n_tiles * tb

    # Only the batch dim is padded; no feature-padded input copy.
    x = state if B_pad == B else jnp.zeros((B_pad, s_dim), state.dtype).at[:B].set(state)

    # ---- VMEM budget (generation-aware) ----
    wsz = jnp.dtype(cd).itemsize
    weight_bytes = ((prep["w_in"].size + prep["w_hid"].size + prep["w_out"].size) * wsz
                    + (prep["b_in"].size + prep["b_hid"].size + prep["b_out"].size) * 4)
    act_bytes = 2 * tb * s_dim * 4 + 2 * tb * 4          # double-buffered in/out blocks
    live_bytes = 3 * tb * h_pad * 4                      # h + matmul temporaries
    # Allow 2x on weights in case single-buffering falls back to the default.
    needed = 2 * weight_bytes + act_bytes + live_bytes
    try:
        vmem_cap = int(pltpu.get_tpu_info().vmem_capacity_bytes)
    except Exception:
        vmem_cap = 64 * 1024 * 1024                      # safe for all generations
    vmem_limit = int(min(max(needed + (4 << 20), 32 << 20), (vmem_cap * 7) // 8))

    flops = int(2 * B_pad * (s_dim * h_pad + num_layers * h_pad * h_pad + h_pad))
    bytes_accessed = int(weight_bytes + 4 * B_pad * (s_dim + 1))

    kernel = functools.partial(_mlp_kernel, num_layers=num_layers, compute_dtype=cd)

    def run(weight_bufs):
        def wspec(shape, index_map):
            # Constant-index weight blocks never change across grid steps;
            # single-buffering halves their VMEM footprint.
            if weight_bufs == 1:
                return pl.BlockSpec(shape, index_map, pipeline_mode=pl.Buffered(1))
            return pl.BlockSpec(shape, index_map)

        return pl.pallas_call(
            kernel,
            grid=(n_tiles,),
            in_specs=[
                pl.BlockSpec((tb, s_dim), lambda i: (i, 0)),        # state tile
                wspec((s_dim, h_pad), lambda i: (0, 0)),            # w_in (resident)
                wspec((1, h_pad), lambda i: (0, 0)),                # b_in
                wspec((Lp, h_pad, h_pad), lambda i: (0, 0, 0)),     # w_hid stack
                wspec((Lp, 1, h_pad), lambda i: (0, 0, 0)),         # b_hid stack
                wspec((1, h_pad), lambda i: (0, 0)),                # w_out row
                wspec((1, 1), lambda i: (0, 0)),                    # b_out scalar
            ],
            # Packed lane-dense output: one (1, tb) row per batch tile.
            out_specs=pl.BlockSpec((None, 1, tb), lambda i: (i, 0, 0)),
            out_shape=jax.ShapeDtypeStruct((n_tiles, 1, tb), jnp.float32),
            compiler_params=pltpu.CompilerParams(
                dimension_semantics=("parallel",),
                vmem_limit_bytes=vmem_limit,
            ),
            cost_estimate=pl.CostEstimate(flops=flops, transcendentals=0,
                                          bytes_accessed=bytes_accessed),
        )(x, prep["w_in"], prep["b_in"], prep["w_hid"], prep["b_hid"],
          prep["w_out"], prep["b_out"])

    try:
        out = run(1)
    except Exception:
        # pl.Buffered(1) pipeline_mode unsupported on this jax/Mosaic build;
        # fall back to default double-buffered weight blocks (same numerics).
        out = run(2)

    return out.reshape(B_pad, 1)[:B]


# ---------------------------------------------------------------------------
# Synthetic init + pure-JAX reference
# ---------------------------------------------------------------------------
def init_params(key, s_dim, h_dim, num_layers):
    """Deterministic synthetic init; weights stored pre-transposed (in, out)."""
    ks = jax.random.split(key, 6)
    scale_in = 1.0 / jnp.sqrt(s_dim)
    scale_h = 1.0 / jnp.sqrt(h_dim)
    return {
        "w_in": jax.random.uniform(ks[0], (s_dim, h_dim), jnp.float32,
                                   -scale_in, scale_in),
        "b_in": jax.random.uniform(ks[1], (1, h_dim), jnp.float32,
                                   -scale_in, scale_in),
        "w_hid": jax.random.uniform(ks[2], (num_layers, h_dim, h_dim),
                                    jnp.float32, -scale_h, scale_h),
        "b_hid": jax.random.uniform(ks[3], (num_layers, 1, h_dim),
                                    jnp.float32, -scale_h, scale_h),
        "w_out": jax.random.uniform(ks[4], (h_dim, 1), jnp.float32,
                                    -scale_h, scale_h),
        "b_out": jax.random.uniform(ks[5], (1, 1), jnp.float32,
                                    -scale_h, scale_h),
    }


def _reference_forward(state, params, num_layers):
    h = jnp.maximum(state @ params["w_in"] + params["b_in"], 0.0)
    for i in range(num_layers):
        h = jnp.maximum(h @ params["w_hid"][i] + params["b_hid"][i], 0.0)
    return h @ params["w_out"] + params["b_out"]


if __name__ == "__main__":
    B, S_DIM, H_DIM, NUM_LAYERS = 8, 4, 32, 2

    key = jax.random.PRNGKey(0)
    k_state, k_params = jax.random.split(key)
    state = jax.random.normal(k_state, (B, S_DIM), dtype=jnp.float32)
    params = init_params(k_params, S_DIM, H_DIM, NUM_LAYERS)
    ref = _reference_forward(state, params, NUM_LAYERS)

    # f32 path (exact vs reference).
    prep_f32 = prepare_params(params, compute_dtype=jnp.float32)
    out = jax.block_until_ready(
        global_net_v_forward(state, prep_f32))
    assert out.shape == (B, 1), out.shape
    assert jnp.allclose(out, ref, atol=1e-5, rtol=1e-5), "f32 mismatch vs reference"

    # bf16 MXU path (f32 accumulation kept); looser tolerance vs f32 reference.
    prep_bf16 = prepare_params(params, compute_dtype=jnp.bfloat16)
    out_bf16 = jax.block_until_ready(
        global_net_v_forward(state, prep_bf16))
    assert jnp.allclose(out_bf16, ref, atol=5e-2, rtol=5e-2), "bf16 mismatch"

    # Ragged batch (not a multiple of 8): wrapper pads batch rows, then slices.
    state5 = jax.random.normal(jax.random.PRNGKey(1), (5, S_DIM), dtype=jnp.float32)
    out5 = jax.block_until_ready(
        global_net_v_forward(state5, prep_f32))
    ref5 = _reference_forward(state5, params, NUM_LAYERS)
    assert out5.shape == (5, 1) and jnp.allclose(out5, ref5, atol=1e-5, rtol=1e-5)

    print("KERNEL_OK")
</pallas_src>

<mosaic_0001>
module attributes {stable_mosaic.version = 11 : i64} {
  func.func @_mlp_kernel(%arg0: i32, %arg1: memref<8x4xf32, #tpu.memory_space<vmem>>, %arg2: memref<4x128xf32, #tpu.memory_space<vmem>>, %arg3: memref<1x128xf32, #tpu.memory_space<vmem>>, %arg4: memref<2x128x128xf32, #tpu.memory_space<vmem>>, %arg5: memref<2x1x128xf32, #tpu.memory_space<vmem>>, %arg6: memref<1x128xf32, #tpu.memory_space<vmem>>, %arg7: memref<1x1xf32, #tpu.memory_space<vmem>>, %arg8: memref<1x1x8xf32, #tpu.memory_space<vmem>>) attributes {dimension_semantics = [#tpu.dimension_semantics<parallel>], iteration_bounds = array<i64: 1>, scalar_prefetch = 0 : i64, scratch_operands = 0 : i64, tpu.core_type = #tpu.core_type<tc>, window_params = [{transform_indices = @transform_0, window_bounds = array<i64: 8, 4>}, {pipeline_mode = #tpu.pipeline_mode<synchronous>, transform_indices = @transform_1, window_bounds = array<i64: 4, 128>}, {pipeline_mode = #tpu.pipeline_mode<synchronous>, transform_indices = @transform_2, window_bounds = array<i64: 1, 128>}, {pipeline_mode = #tpu.pipeline_mode<synchronous>, transform_indices = @transform_3, window_bounds = array<i64: 2, 128, 128>}, {pipeline_mode = #tpu.pipeline_mode<synchronous>, transform_indices = @transform_4, window_bounds = array<i64: 2, 1, 128>}, {pipeline_mode = #tpu.pipeline_mode<synchronous>, transform_indices = @transform_5, window_bounds = array<i64: 1, 128>}, {pipeline_mode = #tpu.pipeline_mode<synchronous>, transform_indices = @transform_6, window_bounds = array<i64: 1, 1>}, {transform_indices = @transform_7, window_bounds = array<i64: 1, 1, 8>}]} {
    %c0 = arith.constant 0 : index
    %c0_0 = arith.constant 0 : index
    %0 = vector.load %arg1[%c0, %c0_0] : memref<8x4xf32, #tpu.memory_space<vmem>>, vector<8x4xf32>
    %c0_1 = arith.constant 0 : index
    %c0_2 = arith.constant 0 : index
    %1 = vector.load %arg2[%c0_1, %c0_2] : memref<4x128xf32, #tpu.memory_space<vmem>>, vector<4x128xf32>
    %cst = arith.constant dense<0.000000e+00> : vector<8x128xf32>
    %2 = tpu.matmul %0, %1, %cst {dimension_numbers = #tpu.dot_dimension_numbers<[1], [0], [0], [1], [0, 0, 1, 1], [], []>} : vector<8x4xf32>, vector<4x128xf32>, vector<8x128xf32> -> vector<8x128xf32>
    %c0_3 = arith.constant 0 : index
    %c0_4 = arith.constant 0 : index
    %3 = vector.load %arg3[%c0_3, %c0_4] : memref<1x128xf32, #tpu.memory_space<vmem>>, vector<1x128xf32>
    %4 = vector.broadcast %3 : vector<1x128xf32> to vector<8x128xf32>
    %5 = arith.addf %2, %4 : vector<8x128xf32>
    %cst_5 = arith.constant 0.000000e+00 : f32
    %6 = vector.broadcast %cst_5 : f32 to vector<8x128xf32>
    %7 = arith.maximumf %5, %6 : vector<8x128xf32>
    %c0_6 = arith.constant 0 : index
    %c0_7 = arith.constant 0 : index
    %c0_8 = arith.constant 0 : index
    %8 = vector.load %arg4[%c0_6, %c0_7, %c0_8] : memref<2x128x128xf32, #tpu.memory_space<vmem>>, vector<1x128x128xf32>
    %9 = vector.shape_cast %8 : vector<1x128x128xf32> to vector<128x128xf32>
    %cst_9 = arith.constant dense<0.000000e+00> : vector<8x128xf32>
    %10 = tpu.matmul %7, %9, %cst_9 {dimension_numbers = #tpu.dot_dimension_numbers<[1], [0], [0], [1], [0, 0, 1, 1], [], []>} : vector<8x128xf32>, vector<128x128xf32>, vector<8x128xf32> -> vector<8x128xf32>
    %c0_10 = arith.constant 0 : index
    %c0_11 = arith.constant 0 : index
    %c0_12 = arith.constant 0 : index
    %11 = vector.load %arg5[%c0_10, %c0_11, %c0_12] : memref<2x1x128xf32, #tpu.memory_space<vmem>>, vector<1x1x128xf32>
    %12 = vector.shape_cast %11 : vector<1x1x128xf32> to vector<1x128xf32>
    %13 = vector.broadcast %12 : vector<1x128xf32> to vector<8x128xf32>
    %14 = arith.addf %10, %13 : vector<8x128xf32>
    %cst_13 = arith.constant 0.000000e+00 : f32
    %15 = vector.broadcast %cst_13 : f32 to vector<8x128xf32>
    %16 = arith.maximumf %14, %15 : vector<8x128xf32>
    %c1 = arith.constant 1 : index
    %c0_14 = arith.constant 0 : index
    %c0_15 = arith.constant 0 : index
    %17 = vector.load %arg4[%c1, %c0_14, %c0_15] : memref<2x128x128xf32, #tpu.memory_space<vmem>>, vector<1x128x128xf32>
    %18 = vector.shape_cast %17 : vector<1x128x128xf32> to vector<128x128xf32>
    %cst_16 = arith.constant dense<0.000000e+00> : vector<8x128xf32>
    %19 = tpu.matmul %16, %18, %cst_16 {dimension_numbers = #tpu.dot_dimension_numbers<[1], [0], [0], [1], [0, 0, 1, 1], [], []>} : vector<8x128xf32>, vector<128x128xf32>, vector<8x128xf32> -> vector<8x128xf32>
    %c1_17 = arith.constant 1 : index
    %c0_18 = arith.constant 0 : index
    %c0_19 = arith.constant 0 : index
    %20 = vector.load %arg5[%c1_17, %c0_18, %c0_19] : memref<2x1x128xf32, #tpu.memory_space<vmem>>, vector<1x1x128xf32>
    %21 = vector.shape_cast %20 : vector<1x1x128xf32> to vector<1x128xf32>
    %22 = vector.broadcast %21 : vector<1x128xf32> to vector<8x128xf32>
    %23 = arith.addf %19, %22 : vector<8x128xf32>
    %cst_20 = arith.constant 0.000000e+00 : f32
    %24 = vector.broadcast %cst_20 : f32 to vector<8x128xf32>
    %25 = arith.maximumf %23, %24 : vector<8x128xf32>
    %c0_21 = arith.constant 0 : index
    %c0_22 = arith.constant 0 : index
    %26 = vector.load %arg6[%c0_21, %c0_22] : memref<1x128xf32, #tpu.memory_space<vmem>>, vector<1x128xf32>
    %cst_23 = arith.constant dense<0.000000e+00> : vector<1x8xf32>
    %27 = tpu.matmul %26, %25, %cst_23 {dimension_numbers = #tpu.dot_dimension_numbers<[1], [1], [0], [0], [0, 0, 1, 0], [], []>} : vector<1x128xf32>, vector<8x128xf32>, vector<1x8xf32> -> vector<1x8xf32>
    %c0_24 = arith.constant 0 : index
    %c0_25 = arith.constant 0 : index
    %28 = vector.load %arg7[%c0_24, %c0_25] : memref<1x1xf32, #tpu.memory_space<vmem>>, vector<1x1xf32>
    %29 = vector.broadcast %28 : vector<1x1xf32> to vector<1x8xf32>
    %30 = arith.addf %27, %29 : vector<1x8xf32>
    %c0_26 = arith.constant 0 : index
    %c0_27 = arith.constant 0 : index
    %c0_28 = arith.constant 0 : index
    %31 = vector.load %arg8[%c0_26, %c0_27, %c0_28] : memref<1x1x8xf32, #tpu.memory_space<vmem>>, vector<1x1x8xf32>
    %32 = vector.shape_cast %31 : vector<1x1x8xf32> to vector<1x8xf32>
    %33 = vector.shape_cast %30 : vector<1x8xf32> to vector<1x1x8xf32>
    tpu.vector_store %arg8[%c0_26, %c0_27, %c0_28], %33 {strides = array<i32>} : memref<1x1x8xf32, #tpu.memory_space<vmem>>, vector<1x1x8xf32>,
    return
  }
  func.func @transform_0(%arg0: i32) -> (i32, i32) {
    %c0_i32 = arith.constant 0 : i32
    %c0_i32_0 = arith.constant 0 : i32
    return %arg0, %c0_i32 : i32, i32
  }
  func.func @transform_1(%arg0: i32) -> (i32, i32) {
    %c0_i32 = arith.constant 0 : i32
    %c0_i32_0 = arith.constant 0 : i32
    %c0_i32_1 = arith.constant 0 : i32
    return %c0_i32, %c0_i32_0 : i32, i32
  }
  func.func @transform_2(%arg0: i32) -> (i32, i32) {
    %c0_i32 = arith.constant 0 : i32
    %c0_i32_0 = arith.constant 0 : i32
    %c0_i32_1 = arith.constant 0 : i32
    return %c0_i32, %c0_i32_0 : i32, i32
  }
  func.func @transform_3(%arg0: i32) -> (i32, i32, i32) {
    %c0_i32 = arith.constant 0 : i32
    %c0_i32_0 = arith.constant 0 : i32
    %c0_i32_1 = arith.constant 0 : i32
    %c0_i32_2 = arith.constant 0 : i32
    return %c0_i32, %c0_i32_0, %c0_i32_1 : i32, i32, i32
  }
  func.func @transform_4(%arg0: i32) -> (i32, i32, i32) {
    %c0_i32 = arith.constant 0 : i32
    %c0_i32_0 = arith.constant 0 : i32
    %c0_i32_1 = arith.constant 0 : i32
    %c0_i32_2 = arith.constant 0 : i32
    return %c0_i32, %c0_i32_0, %c0_i32_1 : i32, i32, i32
  }
  func.func @transform_5(%arg0: i32) -> (i32, i32) {
    %c0_i32 = arith.constant 0 : i32
    %c0_i32_0 = arith.constant 0 : i32
    %c0_i32_1 = arith.constant 0 : i32
    return %c0_i32, %c0_i32_0 : i32, i32
  }
  func.func @transform_6(%arg0: i32) -> (i32, i32) {
    %c0_i32 = arith.constant 0 : i32
    %c0_i32_0 = arith.constant 0 : i32
    %c0_i32_1 = arith.constant 0 : i32
    return %c0_i32, %c0_i32_0 : i32, i32
  }
  func.func @transform_7(%arg0: i32) -> (i32, i32, i32) {
    %c0_i32 = arith.constant 0 : i32
    %c0_i32_0 = arith.constant 0 : i32
    %c0_i32_1 = arith.constant 0 : i32
    return %arg0, %c0_i32, %c0_i32_0 : i32, i32, i32
  }
}

module attributes {stable_mosaic.version = 11 : i64} {
  func.func @_mlp_kernel(%arg0: i32, %arg1: memref<8x4xf32, #tpu.memory_space<vmem>>, %arg2: memref<4x128xf32, #tpu.memory_space<vmem>>, %arg3: memref<1x128xf32, #tpu.memory_space<vmem>>, %arg4: memref<2x128x128xf32, #tpu.memory_space<vmem>>, %arg5: memref<2x1x128xf32, #tpu.memory_space<vmem>>, %arg6: memref<1x128xf32, #tpu.memory_space<vmem>>, %arg7: memref<1x1xf32, #tpu.memory_space<vmem>>, %arg8: memref<1x1x8xf32, #tpu.memory_space<vmem>>) attributes {dimension_semantics = [#tpu.dimension_semantics<parallel>], iteration_bounds = array<i64: 1>, scalar_prefetch = 0 : i64, scratch_operands = 0 : i64, tpu.core_type = #tpu.core_type<tc>, window_params = [{transform_indices = @transform_0, window_bounds = array<i64: 8, 4>}, {pipeline_mode = #tpu.pipeline_mode<synchronous>, transform_indices = @transform_1, window_bounds = array<i64: 4, 128>}, {pipeline_mode = #tpu.pipeline_mode<synchronous>, transform_indices = @transform_2, window_bounds = array<i64: 1, 128>}, {pipeline_mode = #tpu.pipeline_mode<synchronous>, transform_indices = @transform_3, window_bounds = array<i64: 2, 128, 128>}, {pipeline_mode = #tpu.pipeline_mode<synchronous>, transform_indices = @transform_4, window_bounds = array<i64: 2, 1, 128>}, {pipeline_mode = #tpu.pipeline_mode<synchronous>, transform_indices = @transform_5, window_bounds = array<i64: 1, 128>}, {pipeline_mode = #tpu.pipeline_mode<synchronous>, transform_indices = @transform_6, window_bounds = array<i64: 1, 1>}, {transform_indices = @transform_7, window_bounds = array<i64: 1, 1, 8>}]} {
    %c0 = arith.constant 0 : index
    %c0_0 = arith.constant 0 : index
    %0 = vector.load %arg1[%c0, %c0_0] : memref<8x4xf32, #tpu.memory_space<vmem>>, vector<8x4xf32>
    %c0_1 = arith.constant 0 : index
    %c0_2 = arith.constant 0 : index
    %1 = vector.load %arg2[%c0_1, %c0_2] : memref<4x128xf32, #tpu.memory_space<vmem>>, vector<4x128xf32>
    %cst = arith.constant dense<0.000000e+00> : vector<8x128xf32>
    %2 = tpu.matmul %0, %1, %cst {dimension_numbers = #tpu.dot_dimension_numbers<[1], [0], [0], [1], [0, 0, 1, 1], [], []>} : vector<8x4xf32>, vector<4x128xf32>, vector<8x128xf32> -> vector<8x128xf32>
    %c0_3 = arith.constant 0 : index
    %c0_4 = arith.constant 0 : index
    %3 = vector.load %arg3[%c0_3, %c0_4] : memref<1x128xf32, #tpu.memory_space<vmem>>, vector<1x128xf32>
    %4 = vector.broadcast %3 : vector<1x128xf32> to vector<8x128xf32>
    %5 = arith.addf %2, %4 : vector<8x128xf32>
    %cst_5 = arith.constant 0.000000e+00 : f32
    %6 = vector.broadcast %cst_5 : f32 to vector<8x128xf32>
    %7 = arith.maximumf %5, %6 : vector<8x128xf32>
    %c0_6 = arith.constant 0 : index
    %c0_7 = arith.constant 0 : index
    %c0_8 = arith.constant 0 : index
    %8 = vector.load %arg4[%c0_6, %c0_7, %c0_8] : memref<2x128x128xf32, #tpu.memory_space<vmem>>, vector<1x128x128xf32>
    %9 = vector.shape_cast %8 : vector<1x128x128xf32> to vector<128x128xf32>
    %cst_9 = arith.constant dense<0.000000e+00> : vector<8x128xf32>
    %10 = tpu.matmul %7, %9, %cst_9 {dimension_numbers = #tpu.dot_dimension_numbers<[1], [0], [0], [1], [0, 0, 1, 1], [], []>} : vector<8x128xf32>, vector<128x128xf32>, vector<8x128xf32> -> vector<8x128xf32>
    %c0_10 = arith.constant 0 : index
    %c0_11 = arith.constant 0 : index
    %c0_12 = arith.constant 0 : index
    %11 = vector.load %arg5[%c0_10, %c0_11, %c0_12] : memref<2x1x128xf32, #tpu.memory_space<vmem>>, vector<1x1x128xf32>
    %12 = vector.shape_cast %11 : vector<1x1x128xf32> to vector<1x128xf32>
    %13 = vector.broadcast %12 : vector<1x128xf32> to vector<8x128xf32>
    %14 = arith.addf %10, %13 : vector<8x128xf32>
    %cst_13 = arith.constant 0.000000e+00 : f32
    %15 = vector.broadcast %cst_13 : f32 to vector<8x128xf32>
    %16 = arith.maximumf %14, %15 : vector<8x128xf32>
    %c1 = arith.constant 1 : index
    %c0_14 = arith.constant 0 : index
    %c0_15 = arith.constant 0 : index
    %17 = vector.load %arg4[%c1, %c0_14, %c0_15] : memref<2x128x128xf32, #tpu.memory_space<vmem>>, vector<1x128x128xf32>
    %18 = vector.shape_cast %17 : vector<1x128x128xf32> to vector<128x128xf32>
    %cst_16 = arith.constant dense<0.000000e+00> : vector<8x128xf32>
    %19 = tpu.matmul %16, %18, %cst_16 {dimension_numbers = #tpu.dot_dimension_numbers<[1], [0], [0], [1], [0, 0, 1, 1], [], []>} : vector<8x128xf32>, vector<128x128xf32>, vector<8x128xf32> -> vector<8x128xf32>
    %c1_17 = arith.constant 1 : index
    %c0_18 = arith.constant 0 : index
    %c0_19 = arith.constant 0 : index
    %20 = vector.load %arg5[%c1_17, %c0_18, %c0_19] : memref<2x1x128xf32, #tpu.memory_space<vmem>>, vector<1x1x128xf32>
    %21 = vector.shape_cast %20 : vector<1x1x128xf32> to vector<1x128xf32>
    %22 = vector.broadcast %21 : vector<1x128xf32> to vector<8x128xf32>
    %23 = arith.addf %19, %22 : vector<8x128xf32>
    %cst_20 = arith.constant 0.000000e+00 : f32
    %24 = vector.broadcast %cst_20 : f32 to vector<8x128xf32>
    %25 = arith.maximumf %23, %24 : vector<8x128xf32>
    %c0_21 = arith.constant 0 : index
    %c0_22 = arith.constant 0 : index
    %26 = vector.load %arg6[%c0_21, %c0_22] : memref<1x128xf32, #tpu.memory_space<vmem>>, vector<1x128xf32>
    %cst_23 = arith.constant dense<0.000000e+00> : vector<1x8xf32>
    %27 = tpu.matmul %26, %25, %cst_23 {dimension_numbers = #tpu.dot_dimension_numbers<[1], [1], [0], [0], [0, 0, 1, 0], [], []>} : vector<1x128xf32>, vector<8x128xf32>, vector<1x8xf32> -> vector<1x8xf32>
    %c0_24 = arith.constant 0 : index
    %c0_25 = arith.constant 0 : index
    %28 = vector.load %arg7[%c0_24, %c0_25] : memref<1x1xf32, #tpu.memory_space<vmem>>, vector<1x1xf32>
    %29 = vector.broadcast %28 : vector<1x1xf32> to vector<1x8xf32>
    %30 = arith.addf %27, %29 : vector<1x8xf32>
    %c0_26 = arith.constant 0 : index
    %c0_27 = arith.constant 0 : index
    %c0_28 = arith.constant 0 : index
    %31 = vector.load %arg8[%c0_26, %c0_27, %c0_28] : memref<1x1x8xf32, #tpu.memory_space<vmem>>, vector<1x1x8xf32>
    %32 = vector.shape_cast %31 : vector<1x1x8xf32> to vector<1x8xf32>
    %33 = vector.shape_cast %30 : vector<1x8xf32> to vector<1x1x8xf32>
    tpu.vector_store %arg8[%c0_26, %c0_27, %c0_28], %33 {strides = array<i32>} : memref<1x1x8xf32, #tpu.memory_space<vmem>>, vector<1x1x8xf32>,
    return
  }
  func.func @transform_0(%arg0: i32) -> (i32, i32) {
    %c0_i32 = arith.constant 0 : i32
    %c0_i32_0 = arith.constant 0 : i32
    return %arg0, %c0_i32 : i32, i32
  }
  func.func @transform_1(%arg0: i32) -> (i32, i32) {
    %c0_i32 = arith.constant 0 : i32
    %c0_i32_0 = arith.constant 0 : i32
    %c0_i32_1 = arith.constant 0 : i32
    return %c0_i32, %c0_i32_0 : i32, i32
  }
  func.func @transform_2(%arg0: i32) -> (i32, i32) {
    %c0_i32 = arith.constant 0 : i32
    %c0_i32_0 = arith.constant 0 : i32
    %c0_i32_1 = arith.constant 0 : i32
    return %c0_i32, %c0_i32_0 : i32, i32
  }
  func.func @transform_3(%arg0: i32) -> (i32, i32, i32) {
    %c0_i32 = arith.constant 0 : i32
    %c0_i32_0 = arith.constant 0 : i32
    %c0_i32_1 = arith.constant 0 : i32
    %c0_i32_2 = arith.constant 0 : i32
    return %c0_i32, %c0_i32_0, %c0_i32_1 : i32, i32, i32
  }
  func.func @transform_4(%arg0: i32) -> (i32, i32, i32) {
    %c0_i32 = arith.constant 0 : i32
    %c0_i32_0 = arith.constant 0 : i32
    %c0_i32_1 = arith.constant 0 : i32
    %c0_i32_2 = arith.constant 0 : i32
    return %c0_i32, %c0_i32_0, %c0_i32_1 : i32, i32, i32
  }
  func.func @transform_5(%arg0: i32) -> (i32, i32) {
    %c0_i32 = arith.constant 0 : i32
    %c0_i32_0 = arith.constant 0 : i32
    %c0_i32_1 = arith.constant 0 : i32
    return %c0_i32, %c0_i32_0 : i32, i32
  }
  func.func @transform_6(%arg0: i32) -> (i32, i32) {
    %c0_i32 = arith.constant 0 : i32
    %c0_i32_0 = arith.constant 0 : i32
    %c0_i32_1 = arith.constant 0 : i32
    return %c0_i32, %c0_i32_0 : i32, i32
  }
  func.func @transform_7(%arg0: i32) -> (i32, i32, i32) {
    %c0_i32 = arith.constant 0 : i32
    %c0_i32_0 = arith.constant 0 : i32
    %c0_i32_1 = arith.constant 0 : i32
    return %arg0, %c0_i32, %c0_i32_0 : i32, i32, i32
  }
}

</mosaic_0001>

<bundles_post_ra>
// kernel: tpu_custom_call.1
= control target key start
LH: loop header
LB: loop body
LE: loop exit
PB: predicated region body
PF: predicated region fallthrough
CT: control target
= control target key end

     0   :  { %s711_s0 = inlined_call_operand.vmem [shape: f32[8,4], index: 0, kind: input, shape index: {}]   ;;  %s712_s1 = inlined_call_operand.vmem [shape: f32[4,128], index: 1, kind: input, shape index: {}]   ;;  %s713_s2 = inlined_call_operand.vmem [shape: f32[1,128], index: 2, kind: input, shape index: {}]   ;;  %s714_s3 = inlined_call_operand.hbm [shape: f32[2,128,128], index: 3, kind: input, shape index: {}]   ;;  %s715_s4 = inlined_call_operand.vmem [shape: f32[2,1,128], index: 4, kind: input, shape index: {}]   ;;  %s716_s5 = inlined_call_operand.vmem [shape: f32[1,128], index: 5, kind: input, shape index: {}]   ;;  %s717_s6 = inlined_call_operand.<no memory space> [shape: f32[1,1], index: 6, kind: input, shape index: {}]   ;;  %s718_s7 = inlined_call_operand.hbm [shape: f32[1,1,8], index: 7, kind: output, shape index: {}]  }
   0x1   :  { %v12_v0 = vstv %s717_s6 }
   0x2   :  { %13 = vst [vmem:[#allocation2] sm:$0x1] %v12_v0 }
   0x3   :  { %14 = vsyncpa [#allocation4], 0 }
   0x4   :  { %15 = vsyncpa [#allocation5], 0  ;;  %s595_s26 = smov [#allocation3]  }
   0x5   :  { %s27_s27 = sshll.u32 %s595_s26, 4  ;;  %s28_s27 = int_to_ptr.vmem [resolvable:$true] %s27_s27 }
   0x6   :  { %s559_s28 = scalar_lea.vmem %s28_s27, 4096  ;;  %p564_p1 = scmp.lt.s32.totalorder %s28_s27, %s28_s27 }
   0x7   :  { %p560_p0 = scmp.ne.s32.totalorder %s28_s27, %s559_s28  ;;  %p565_p2 = scmp.lt.s32.totalorder %s559_s28, %s559_s28 }
   0x9   :  { %p566_p3 = por %p565_p2, %p564_p1 }
   0xb   :  { %p567_p4 = pnand %p566_p3, %p560_p0 }
   0xd   :  { %570 = shalt.err (!%p567_p4)
}
   0xe   :  { %s596_s29 = smov 128   ;;  %s597_s30 = smov 8  }
   0xf   :  { %33 = dma.hbm_to_vmem [thread:$0]  %s714_s3, 4096, %s28_s27, [#allocation4], %s596_s29, %s596_s29, %s597_s30  }
  0x10   :  { %591 = dma.done.wait [#allocation4], 4096  }
  0x11   :  { %592 = vsyncadd [#allocation4], 4294963200  ;;  %v598_v1 = vmov 0.0   ;;  %vm599_vm0 = vmmov 0   ;;  %vm56_vm1 = vcmask 1043456   ;;  %vm52_vm2 = vcmask 31744  }
  0x12   :  { %463 = vmatprep.subr.mxu0 %v598_v1  ;;  %465 = vmatprep.mubr.msk.f32.mxu0 %vm599_vm0, %v598_v1  ;;  %v44_v2 = vld [vmem:[%s712_s1] sm:$0xf]  ;;  %v145_v5 = vld [vmem:[#allocation3 + $0x70] sm:$0xff]  ;;  %v144_v6 = vld [vmem:[#allocation3 + $0x68] sm:$0xff]  ;;  %v600_v47 = vmov 0   ;;  %v328_v54 = vlaneseq  ;;  %s601_s17 = smov [#allocation6]  }
  0x13   :  { %468 = vmatprep.subr.mxu1 %v598_v1  ;;  %500 = vmatprep.mubr.msk.f32.mxu1 %vm599_vm0, %v598_v1  ;;  %v43_v3 = vld [vmem:[%s711_s0] sm:$0xff]  ;;  %v141_v9 = vld [vmem:[#allocation3 + $0x50] sm:$0xff]  ;;  %v140_v10 = vld [vmem:[#allocation3 + $0x48] sm:$0xff]  ;;  %s410_s18 = sshll.u32 %s601_s17, 4  ;;  %vm402_vm3 = vcmask 57344   ;;  %s411_s18 = int_to_ptr.vmem [resolvable:$true] %s410_s18 }
  0x14   :  { %v146_v4 = vld [vmem:[#allocation3 + $0x78] sm:$0xff]  ;;  %464 = vmatpush3.msk.msra.mxu0 %vm56_vm1, %v44_v2  ;;  %v143_v7 = vld [vmem:[#allocation3 + $0x60] sm:$0xff]  ;;  %v137_v13 = vld [vmem:[#allocation3 + $0x30] sm:$0xff]  ;;  %550 = vset.pattern.permute.xlu0 %v600_v47  ;;  %v329_v55 = vshrl.u32 %v328_v54, 7  ;;  %s575_s19 = scalar_lea.vmem %s411_s18, 32  ;;  %p576_p6 = scmp.lt.s32.totalorder %s411_s18, %s411_s18 }
  0x15   :  { %469 = vmatpush3.msra.mxu1 %v146_v4  ;;  %466 = vmatmul.mubr.msk.f32.vlgmr.msra.gmra.mxu0 %vm52_vm2, %v43_v3  ;;  %v142_v8 = vld [vmem:[#allocation3 + $0x58] sm:$0xff]  ;;  %v139_v11 = vld [vmem:[#allocation3 + $0x40] sm:$0xff]  ;;  %v136_v14 = vld [vmem:[#allocation3 + $0x28] sm:$0xff] }
  0x16   :  { %470 = vmatprep.subr.mxu1 %v598_v1  ;;  %503 = vmatprep.subr.mxu0 %v598_v1  ;;  %v138_v12 = vld [vmem:[#allocation3 + $0x38] sm:$0xff]  ;;  %v135_v15 = vld [vmem:[#allocation3 + $0x20] sm:$0xff]  ;;  %v133_v17 = vld [vmem:[#allocation3 + $0x10] sm:$0xff]  ;;  %v330_v56 = vsub.s32 0, %v329_v55 }
  0x17   :  { %471 = vmatpush3.msra.mxu1 %v145_v5  ;;  %535 = vmatprep.mubr.msk.f32.mxu0 %vm599_vm0, %v598_v1  ;;  %v134_v16 = vld [vmem:[#allocation3 + $0x18] sm:$0xff]  ;;  %v132_v18 = vld [vmem:[#allocation3 + $0x8] sm:$0xff]  ;;  %v131_v19 = vld [vmem:[#allocation3] sm:$0xff] }
  0x18   :  { %472 = vmatprep.subr.mxu1 %v598_v1  ;;  %v241_v20 = vld [vmem:[#allocation3 + $0xf8] sm:$0xff]  ;;  %v240_v21 = vld [vmem:[#allocation3 + $0xf0] sm:$0xff]  ;;  %v239_v22 = vld [vmem:[#allocation3 + $0xe8] sm:$0xff] }
  0x19   :  { %473 = vmatpush3.msra.mxu1 %v144_v6  ;;  %504 = vmatpush3.msra.mxu0 %v241_v20  ;;  %v238_v23 = vld [vmem:[#allocation3 + $0xe0] sm:$0xff]  ;;  %v237_v24 = vld [vmem:[#allocation3 + $0xd8] sm:$0xff]  ;;  %v236_v25 = vld [vmem:[#allocation3 + $0xd0] sm:$0xff] }
  0x1a   :  { %474 = vmatprep.subr.mxu1 %v598_v1  ;;  %505 = vmatprep.subr.mxu0 %v598_v1  ;;  %v235_v26 = vld [vmem:[#allocation3 + $0xc8] sm:$0xff]  ;;  %v234_v27 = vld [vmem:[#allocation3 + $0xc0] sm:$0xff]  ;;  %v233_v28 = vld [vmem:[#allocation3 + $0xb8] sm:$0xff] }
  0x1b   :  { %475 = vmatpush3.msra.mxu1 %v143_v7  ;;  %506 = vmatpush3.msra.mxu0 %v240_v21  ;;  %v232_v29 = vld [vmem:[#allocation3 + $0xb0] sm:$0xff]  ;;  %v231_v30 = vld [vmem:[#allocation3 + $0xa8] sm:$0xff]  ;;  %v230_v31 = vld [vmem:[#allocation3 + $0xa0] sm:$0xff] }
  0x1c   :  { %476 = vmatprep.subr.mxu1 %v598_v1  ;;  %507 = vmatprep.subr.mxu0 %v598_v1  ;;  %v229_v32 = vld [vmem:[#allocation3 + $0x98] sm:$0xff]  ;;  %v228_v38 = vld [vmem:[#allocation3 + $0x90] sm:$0xff]  ;;  %v227_v39 = vld [vmem:[#allocation3 + $0x88] sm:$0xff] }
  0x1d   :  { %477 = vmatpush3.msra.mxu1 %v142_v8  ;;  %508 = vmatpush3.msra.mxu0 %v239_v22  ;;  %v419_v33 = vld [vmem:[%s713_s2] ss:$0 sm:$0xff]  ;;  %v226_v40 = vld [vmem:[#allocation3 + $0x80] sm:$0xff] }
  0x1e   :  { %478 = vmatprep.subr.mxu1 %v598_v1  ;;  %509 = vmatprep.subr.mxu0 %v598_v1  ;;  %v422_v41 = vld [vmem:[%s715_s4] ss:$0 sm:$0xff]  ;;  %v424_v48 = vld [vmem:[%s715_s4 + $0x1] ss:$0 sm:$0xff]  ;;  %s571_s4 = scalar_lea.vmem %s411_s18, 16 }
  0x1f   :  { %479 = vmatpush3.msra.mxu1 %v141_v9  ;;  %510 = vmatpush3.msra.mxu0 %v238_v23  ;;  %v322_v46 = vld [vmem:[#allocation2] sm:$0x1]  ;;  %p572_p5 = scmp.ne.s32.totalorder %s411_s18, %s571_s4  ;;  %p577_p7 = scmp.lt.s32.totalorder %s575_s19, %s571_s4 }
  0x20   :  { %480 = vmatprep.subr.mxu1 %v598_v1  ;;  %511 = vmatprep.subr.mxu0 %v598_v1  ;;  %v321_v53 = vld [vmem:[%s716_s5] sm:$0x1] }
  0x21   :  { %481 = vmatpush3.msra.mxu1 %v140_v10  ;;  %512 = vmatpush3.msra.mxu0 %v237_v24  ;;  %p578_p8 = por %p577_p7, %p576_p6 }
  0x22   :  { %482 = vmatprep.subr.mxu1 %v598_v1  ;;  %513 = vmatprep.subr.mxu0 %v598_v1 }
  0x23   :  { %483 = vmatpush3.msra.mxu1 %v139_v11  ;;  %514 = vmatpush3.msra.mxu0 %v236_v25  ;;  %p579_p9 = pnand %p578_p8, %p572_p5 }
  0x24   :  { %484 = vmatprep.subr.mxu1 %v598_v1  ;;  %515 = vmatprep.subr.mxu0 %v598_v1 }
  0x25   :  { %485 = vmatpush3.msra.mxu1 %v138_v12  ;;  %516 = vmatpush3.msra.mxu0 %v235_v26 }
  0x26   :  { %486 = vmatprep.subr.mxu1 %v598_v1  ;;  %517 = vmatprep.subr.mxu0 %v598_v1 }
  0x27   :  { %487 = vmatpush3.msra.mxu1 %v137_v13  ;;  %518 = vmatpush3.msra.mxu0 %v234_v27 }
  0x28   :  { %488 = vmatprep.subr.mxu1 %v598_v1  ;;  %519 = vmatprep.subr.mxu0 %v598_v1 }
  0x29   :  { %489 = vmatpush3.msra.mxu1 %v136_v14  ;;  %520 = vmatpush3.msra.mxu0 %v233_v28 }
  0x2a   :  { %490 = vmatprep.subr.mxu1 %v598_v1  ;;  %521 = vmatprep.subr.mxu0 %v598_v1 }
  0x2b   :  { %491 = vmatpush3.msra.mxu1 %v135_v15  ;;  %522 = vmatpush3.msra.mxu0 %v232_v29 }
  0x2c   :  { %492 = vmatprep.subr.mxu1 %v598_v1  ;;  %523 = vmatprep.subr.mxu0 %v598_v1 }
  0x2d   :  { %493 = vmatpush3.msra.mxu1 %v134_v16  ;;  %524 = vmatpush3.msra.mxu0 %v231_v30 }
  0x2e   :  { %494 = vmatprep.subr.mxu1 %v598_v1  ;;  %525 = vmatprep.subr.mxu0 %v598_v1 }
  0x2f   :  { %495 = vmatpush3.msra.mxu1 %v133_v17  ;;  %526 = vmatpush3.msra.mxu0 %v230_v31 }
  0x30   :  { %496 = vmatprep.subr.mxu1 %v598_v1  ;;  %527 = vmatprep.subr.mxu0 %v598_v1 }
  0x31   :  { %497 = vmatpush3.msra.mxu1 %v132_v18  ;;  %528 = vmatpush3.msra.mxu0 %v229_v32 }
  0x32   :  { %498 = vmatprep.subr.mxu1 %v598_v1  ;;  %529 = vmatprep.subr.mxu0 %v598_v1 }
  0x33   :  { %499 = vmatpush3.msra.mxu1 %v131_v19  ;;  %530 = vmatpush3.msra.mxu0 %v228_v38 }
  0x34   :  { %538 = vmatprep.subr.mxu1 %v598_v1  ;;  %531 = vmatprep.subr.mxu0 %v598_v1 }
  0x35   :  { %532 = vmatpush3.msra.mxu0 %v227_v39  ;;  %325 = vperm.xlu0 %550, %v322_v46  }
  0x36   :  { %533 = vmatprep.subr.mxu0 %v598_v1 }
  0x37   :  { %534 = vmatpush3.msra.mxu0 %v226_v40 }
  0xb0   :  { %v326_v57 = vpop.permute.xlu0 %325 }
  0xb1   :  { %v331_v58 = vrot.slane %v326_v57, %v330_v56 }
  0xd5   :  { %v126_v34 = vpop.f32.mrf.mxu0 }
  0xd6   :  { %v127_v35 = vadd.f32 %v419_v33, %v126_v34 }
  0xd7   :  { %v467_v36 = vpop.f32.mrf.mxu0 }
  0xd8   :  { %v130_v37 = vmax.f32 %v127_v35, 0.0 }
  0xda   :  { %501 = vmatmul.mubr.f32.vlgmr.msra.gmra.mxu1 %v130_v37 }
  0xdb   :  { %540 = vmatprep.mubr.msk.f32.mxu1 %vm599_vm0, %v598_v1 }
 0x19a   :  { %v220_v42 = vpop.f32.mrf.mxu1 }
 0x19b   :  { %v221_v43 = vadd.f32 %v422_v41, %v220_v42 }
 0x19c   :  { %v502_v44 = vpop.f32.mrf.mxu1 }
 0x19d   :  { %v224_v45 = vmax.f32 %v221_v43, 0.0 }
 0x19f   :  { %536 = vmatmul.mubr.f32.vlgmr.msra.gmra.mxu0 %v224_v45 }
 0x25f   :  { %v316_v49 = vpop.f32.mrf.mxu0 }
 0x260   :  { %v317_v50 = vadd.f32 %v424_v48, %v316_v49 }
 0x261   :  { %v537_v51 = vpop.f32.mrf.mxu0 }
 0x262   :  { %v320_v52 = vmax.f32 %v317_v50, 0.0 }
 0x264   :  { %539 = vmatpush3.xpose.msra.mxu1 %v320_v52 }
 0x267   :  { %541 = vmatmul.mubr.f32.vlgmr.msra.gmra.mxu1 %v321_v53 }
 0x327   :  { %v398_v59 = vpop.f32.mrf.mxu1 }
 0x328   :  { %v399_v60 = vadd.f32 %v398_v59, %v331_v58 }
 0x329   :  { %v542_v61 = vpop.f32.mrf.mxu1 }
 0x32a   :  { %403 = vst.msk [vmem:[#allocation6] sm:$0x1] %vm402_vm3, %v399_v60 }
 0x32b   :  { %582 = shalt.err (!%p579_p9)
}
 0x32c   :  { %413 = dma.vmem_to_hbm [thread:$0]  %s411_s18, 16, %s718_s7, [#allocation5]  }
 0x32d   :  { %593 = dma.done.wait [#allocation5], 16  }
 0x32e   :  { %594 = vsyncadd [#allocation5], 4294967280 }
 0x32f   :  { %417 = vsyncpa [#allocation4], 1 }
 0x330   :  { %418 = vsyncpa [#allocation5], 1 }

// kernel: tpu_custom_call.1
= control target key start
LH: loop header
LB: loop body
LE: loop exit
PB: predicated region body
PF: predicated region fallthrough
CT: control target
= control target key end

     0   :  { %s711_s0 = inlined_call_operand.vmem [shape: f32[8,4], index: 0, kind: input, shape index: {}]   ;;  %s712_s1 = inlined_call_operand.vmem [shape: f32[4,128], index: 1, kind: input, shape index: {}]   ;;  %s713_s2 = inlined_call_operand.vmem [shape: f32[1,128], index: 2, kind: input, shape index: {}]   ;;  %s714_s3 = inlined_call_operand.hbm [shape: f32[2,128,128], index: 3, kind: input, shape index: {}]   ;;  %s715_s4 = inlined_call_operand.vmem [shape: f32[2,1,128], index: 4, kind: input, shape index: {}]   ;;  %s716_s5 = inlined_call_operand.vmem [shape: f32[1,128], index: 5, kind: input, shape index: {}]   ;;  %s717_s6 = inlined_call_operand.<no memory space> [shape: f32[1,1], index: 6, kind: input, shape index: {}]   ;;  %s718_s7 = inlined_call_operand.hbm [shape: f32[1,1,8], index: 7, kind: output, shape index: {}]  }
   0x1   :  { %v12_v0 = vstv %s717_s6 }
   0x2   :  { %13 = vst [vmem:[#allocation2] sm:$0x1] %v12_v0 }
   0x3   :  { %14 = vsyncpa [#allocation4], 0 }
   0x4   :  { %15 = vsyncpa [#allocation5], 0  ;;  %s595_s26 = smov [#allocation3]  }
   0x5   :  { %s27_s27 = sshll.u32 %s595_s26, 4  ;;  %s28_s27 = int_to_ptr.vmem [resolvable:$true] %s27_s27 }
   0x6   :  { %s559_s28 = scalar_lea.vmem %s28_s27, 4096  ;;  %p564_p1 = scmp.lt.s32.totalorder %s28_s27, %s28_s27 }
   0x7   :  { %p560_p0 = scmp.ne.s32.totalorder %s28_s27, %s559_s28  ;;  %p565_p2 = scmp.lt.s32.totalorder %s559_s28, %s559_s28 }
   0x9   :  { %p566_p3 = por %p565_p2, %p564_p1 }
   0xb   :  { %p567_p4 = pnand %p566_p3, %p560_p0 }
   0xd   :  { %570 = shalt.err (!%p567_p4)
}
   0xe   :  { %s596_s29 = smov 128   ;;  %s597_s30 = smov 8  }
   0xf   :  { %33 = dma.hbm_to_vmem [thread:$0]  %s714_s3, 4096, %s28_s27, [#allocation4], %s596_s29, %s596_s29, %s597_s30  }
  0x10   :  { %591 = dma.done.wait [#allocation4], 4096  }
  0x11   :  { %592 = vsyncadd [#allocation4], 4294963200  ;;  %v598_v1 = vmov 0.0   ;;  %vm599_vm0 = vmmov 0   ;;  %vm56_vm1 = vcmask 1043456   ;;  %vm52_vm2 = vcmask 31744  }
  0x12   :  { %463 = vmatprep.subr.mxu0 %v598_v1  ;;  %465 = vmatprep.mubr.msk.f32.mxu0 %vm599_vm0, %v598_v1  ;;  %v44_v2 = vld [vmem:[%s712_s1] sm:$0xf]  ;;  %v145_v5 = vld [vmem:[#allocation3 + $0x70] sm:$0xff]  ;;  %v144_v6 = vld [vmem:[#allocation3 + $0x68] sm:$0xff]  ;;  %v600_v47 = vmov 0   ;;  %v328_v54 = vlaneseq  ;;  %s601_s17 = smov [#allocation6]  }
  0x13   :  { %468 = vmatprep.subr.mxu1 %v598_v1  ;;  %500 = vmatprep.mubr.msk.f32.mxu1 %vm599_vm0, %v598_v1  ;;  %v43_v3 = vld [vmem:[%s711_s0] sm:$0xff]  ;;  %v141_v9 = vld [vmem:[#allocation3 + $0x50] sm:$0xff]  ;;  %v140_v10 = vld [vmem:[#allocation3 + $0x48] sm:$0xff]  ;;  %s410_s18 = sshll.u32 %s601_s17, 4  ;;  %vm402_vm3 = vcmask 57344   ;;  %s411_s18 = int_to_ptr.vmem [resolvable:$true] %s410_s18 }
  0x14   :  { %v146_v4 = vld [vmem:[#allocation3 + $0x78] sm:$0xff]  ;;  %464 = vmatpush3.msk.msra.mxu0 %vm56_vm1, %v44_v2  ;;  %v143_v7 = vld [vmem:[#allocation3 + $0x60] sm:$0xff]  ;;  %v137_v13 = vld [vmem:[#allocation3 + $0x30] sm:$0xff]  ;;  %550 = vset.pattern.permute.xlu0 %v600_v47  ;;  %v329_v55 = vshrl.u32 %v328_v54, 7  ;;  %s575_s19 = scalar_lea.vmem %s411_s18, 32  ;;  %p576_p6 = scmp.lt.s32.totalorder %s411_s18, %s411_s18 }
  0x15   :  { %469 = vmatpush3.msra.mxu1 %v146_v4  ;;  %466 = vmatmul.mubr.msk.f32.vlgmr.msra.gmra.mxu0 %vm52_vm2, %v43_v3  ;;  %v142_v8 = vld [vmem:[#allocation3 + $0x58] sm:$0xff]  ;;  %v139_v11 = vld [vmem:[#allocation3 + $0x40] sm:$0xff]  ;;  %v136_v14 = vld [vmem:[#allocation3 + $0x28] sm:$0xff] }
  0x16   :  { %470 = vmatprep.subr.mxu1 %v598_v1  ;;  %503 = vmatprep.subr.mxu0 %v598_v1  ;;  %v138_v12 = vld [vmem:[#allocation3 + $0x38] sm:$0xff]  ;;  %v135_v15 = vld [vmem:[#allocation3 + $0x20] sm:$0xff]  ;;  %v133_v17 = vld [vmem:[#allocation3 + $0x10] sm:$0xff]  ;;  %v330_v56 = vsub.s32 0, %v329_v55 }
  0x17   :  { %471 = vmatpush3.msra.mxu1 %v145_v5  ;;  %535 = vmatprep.mubr.msk.f32.mxu0 %vm599_vm0, %v598_v1  ;;  %v134_v16 = vld [vmem:[#allocation3 + $0x18] sm:$0xff]  ;;  %v132_v18 = vld [vmem:[#allocation3 + $0x8] sm:$0xff]  ;;  %v131_v19 = vld [vmem:[#allocation3] sm:$0xff] }
  0x18   :  { %472 = vmatprep.subr.mxu1 %v598_v1  ;;  %v241_v20 = vld [vmem:[#allocation3 + $0xf8] sm:$0xff]  ;;  %v240_v21 = vld [vmem:[#allocation3 + $0xf0] sm:$0xff]  ;;  %v239_v22 = vld [vmem:[#allocation3 + $0xe8] sm:$0xff] }
  0x19   :  { %473 = vmatpush3.msra.mxu1 %v144_v6  ;;  %504 = vmatpush3.msra.mxu0 %v241_v20  ;;  %v238_v23 = vld [vmem:[#allocation3 + $0xe0] sm:$0xff]  ;;  %v237_v24 = vld [vmem:[#allocation3 + $0xd8] sm:$0xff]  ;;  %v236_v25 = vld [vmem:[#allocation3 + $0xd0] sm:$0xff] }
  0x1a   :  { %474 = vmatprep.subr.mxu1 %v598_v1  ;;  %505 = vmatprep.subr.mxu0 %v598_v1  ;;  %v235_v26 = vld [vmem:[#allocation3 + $0xc8] sm:$0xff]  ;;  %v234_v27 = vld [vmem:[#allocation3 + $0xc0] sm:$0xff]  ;;  %v233_v28 = vld [vmem:[#allocation3 + $0xb8] sm:$0xff] }
  0x1b   :  { %475 = vmatpush3.msra.mxu1 %v143_v7  ;;  %506 = vmatpush3.msra.mxu0 %v240_v21  ;;  %v232_v29 = vld [vmem:[#allocation3 + $0xb0] sm:$0xff]  ;;  %v231_v30 = vld [vmem:[#allocation3 + $0xa8] sm:$0xff]  ;;  %v230_v31 = vld [vmem:[#allocation3 + $0xa0] sm:$0xff] }
  0x1c   :  { %476 = vmatprep.subr.mxu1 %v598_v1  ;;  %507 = vmatprep.subr.mxu0 %v598_v1  ;;  %v229_v32 = vld [vmem:[#allocation3 + $0x98] sm:$0xff]  ;;  %v228_v38 = vld [vmem:[#allocation3 + $0x90] sm:$0xff]  ;;  %v227_v39 = vld [vmem:[#allocation3 + $0x88] sm:$0xff] }
  0x1d   :  { %477 = vmatpush3.msra.mxu1 %v142_v8  ;;  %508 = vmatpush3.msra.mxu0 %v239_v22  ;;  %v419_v33 = vld [vmem:[%s713_s2] ss:$0 sm:$0xff]  ;;  %v226_v40 = vld [vmem:[#allocation3 + $0x80] sm:$0xff] }
  0x1e   :  { %478 = vmatprep.subr.mxu1 %v598_v1  ;;  %509 = vmatprep.subr.mxu0 %v598_v1  ;;  %v422_v41 = vld [vmem:[%s715_s4] ss:$0 sm:$0xff]  ;;  %v424_v48 = vld [vmem:[%s715_s4 + $0x1] ss:$0 sm:$0xff]  ;;  %s571_s4 = scalar_lea.vmem %s411_s18, 16 }
  0x1f   :  { %479 = vmatpush3.msra.mxu1 %v141_v9  ;;  %510 = vmatpush3.msra.mxu0 %v238_v23  ;;  %v322_v46 = vld [vmem:[#allocation2] sm:$0x1]  ;;  %p572_p5 = scmp.ne.s32.totalorder %s411_s18, %s571_s4  ;;  %p577_p7 = scmp.lt.s32.totalorder %s575_s19, %s571_s4 }
  0x20   :  { %480 = vmatprep.subr.mxu1 %v598_v1  ;;  %511 = vmatprep.subr.mxu0 %v598_v1  ;;  %v321_v53 = vld [vmem:[%s716_s5] sm:$0x1] }
  0x21   :  { %481 = vmatpush3.msra.mxu1 %v140_v10  ;;  %512 = vmatpush3.msra.mxu0 %v237_v24  ;;  %p578_p8 = por %p577_p7, %p576_p6 }
  0x22   :  { %482 = vmatprep.subr.mxu1 %v598_v1  ;;  %513 = vmatprep.subr.mxu0 %v598_v1 }
  0x23   :  { %483 = vmatpush3.msra.mxu1 %v139_v11  ;;  %514 = vmatpush3.msra.mxu0 %v236_v25  ;;  %p579_p9 = pnand %p578_p8, %p572_p5 }
  0x24   :  { %484 = vmatprep.subr.mxu1 %v598_v1  ;;  %515 = vmatprep.subr.mxu0 %v598_v1 }
  0x25   :  { %485 = vmatpush3.msra.mxu1 %v138_v12  ;;  %516 = vmatpush3.msra.mxu0 %v235_v26 }
  0x26   :  { %486 = vmatprep.subr.mxu1 %v598_v1  ;;  %517 = vmatprep.subr.mxu0 %v598_v1 }
  0x27   :  { %487 = vmatpush3.msra.mxu1 %v137_v13  ;;  %518 = vmatpush3.msra.mxu0 %v234_v27 }
  0x28   :  { %488 = vmatprep.subr.mxu1 %v598_v1  ;;  %519 = vmatprep.subr.mxu0 %v598_v1 }
  0x29   :  { %489 = vmatpush3.msra.mxu1 %v136_v14  ;;  %520 = vmatpush3.msra.mxu0 %v233_v28 }
  0x2a   :  { %490 = vmatprep.subr.mxu1 %v598_v1  ;;  %521 = vmatprep.subr.mxu0 %v598_v1 }
  0x2b   :  { %491 = vmatpush3.msra.mxu1 %v135_v15  ;;  %522 = vmatpush3.msra.mxu0 %v232_v29 }
  0x2c   :  { %492 = vmatprep.subr.mxu1 %v598_v1  ;;  %523 = vmatprep.subr.mxu0 %v598_v1 }
  0x2d   :  { %493 = vmatpush3.msra.mxu1 %v134_v16  ;;  %524 = vmatpush3.msra.mxu0 %v231_v30 }
  0x2e   :  { %494 = vmatprep.subr.mxu1 %v598_v1  ;;  %525 = vmatprep.subr.mxu0 %v598_v1 }
  0x2f   :  { %495 = vmatpush3.msra.mxu1 %v133_v17  ;;  %526 = vmatpush3.msra.mxu0 %v230_v31 }
  0x30   :  { %496 = vmatprep.subr.mxu1 %v598_v1  ;;  %527 = vmatprep.subr.mxu0 %v598_v1 }
  0x31   :  { %497 = vmatpush3.msra.mxu1 %v132_v18  ;;  %528 = vmatpush3.msra.mxu0 %v229_v32 }
  0x32   :  { %498 = vmatprep.subr.mxu1 %v598_v1  ;;  %529 = vmatprep.subr.mxu0 %v598_v1 }
  0x33   :  { %499 = vmatpush3.msra.mxu1 %v131_v19  ;;  %530 = vmatpush3.msra.mxu0 %v228_v38 }
  0x34   :  { %538 = vmatprep.subr.mxu1 %v598_v1  ;;  %531 = vmatprep.subr.mxu0 %v598_v1 }
  0x35   :  { %532 = vmatpush3.msra.mxu0 %v227_v39  ;;  %325 = vperm.xlu0 %550, %v322_v46  }
  0x36   :  { %533 = vmatprep.subr.mxu0 %v598_v1 }
  0x37   :  { %534 = vmatpush3.msra.mxu0 %v226_v40 }
  0xb0   :  { %v326_v57 = vpop.permute.xlu0 %325 }
  0xb1   :  { %v331_v58 = vrot.slane %v326_v57, %v330_v56 }
  0xd5   :  { %v126_v34 = vpop.f32.mrf.mxu0 }
  0xd6   :  { %v127_v35 = vadd.f32 %v419_v33, %v126_v34 }
  0xd7   :  { %v467_v36 = vpop.f32.mrf.mxu0 }
  0xd8   :  { %v130_v37 = vmax.f32 %v127_v35, 0.0 }
  0xda   :  { %501 = vmatmul.mubr.f32.vlgmr.msra.gmra.mxu1 %v130_v37 }
  0xdb   :  { %540 = vmatprep.mubr.msk.f32.mxu1 %vm599_vm0, %v598_v1 }
 0x19a   :  { %v220_v42 = vpop.f32.mrf.mxu1 }
 0x19b   :  { %v221_v43 = vadd.f32 %v422_v41, %v220_v42 }
 0x19c   :  { %v502_v44 = vpop.f32.mrf.mxu1 }
 0x19d   :  { %v224_v45 = vmax.f32 %v221_v43, 0.0 }
 0x19f   :  { %536 = vmatmul.mubr.f32.vlgmr.msra.gmra.mxu0 %v224_v45 }
 0x25f   :  { %v316_v49 = vpop.f32.mrf.mxu0 }
 0x260   :  { %v317_v50 = vadd.f32 %v424_v48, %v316_v49 }
 0x261   :  { %v537_v51 = vpop.f32.mrf.mxu0 }
 0x262   :  { %v320_v52 = vmax.f32 %v317_v50, 0.0 }
 0x264   :  { %539 = vmatpush3.xpose.msra.mxu1 %v320_v52 }
 0x267   :  { %541 = vmatmul.mubr.f32.vlgmr.msra.gmra.mxu1 %v321_v53 }
 0x327   :  { %v398_v59 = vpop.f32.mrf.mxu1 }
 0x328   :  { %v399_v60 = vadd.f32 %v398_v59, %v331_v58 }
 0x329   :  { %v542_v61 = vpop.f32.mrf.mxu1 }
 0x32a   :  { %403 = vst.msk [vmem:[#allocation6] sm:$0x1] %vm402_vm3, %v399_v60 }
 0x32b   :  { %582 = shalt.err (!%p579_p9)
}
 0x32c   :  { %413 = dma.vmem_to_hbm [thread:$0]  %s411_s18, 16, %s718_s7, [#allocation5]  }
 0x32d   :  { %593 = dma.done.wait [#allocation5], 16  }
 0x32e   :  { %594 = vsyncadd [#allocation5], 4294967280 }
 0x32f   :  { %417 = vsyncpa [#allocation4], 1 }
 0x330   :  { %418 = vsyncpa [#allocation5], 1 }

</bundles_post_ra>
